<compile_context>
chip_gen: v7x
topology: tpu7x:2x2x1
jax: 0.10.0
libtpu: 0.0.40
codegen_flags: <defaults>
</compile_context>

<pallas_src>
import functools

import jax
import jax.numpy as jnp
from jax.experimental import pallas as pl
from jax.experimental.pallas import tpu as pltpu


# ------------------------------- helpers ----------------------------------- #
def _round_up(x, m):
    return (x + m - 1) // m * m


def _padded_block_bytes(shape, dtype):
    """VMEM bytes of one pipeline buffer for a block, incl. TPU layout padding."""
    itemsize = jnp.dtype(dtype).itemsize
    dims = list(shape)
    if len(dims) >= 1:
        dims[-1] = _round_up(dims[-1], 128)                       # lane dim
    if len(dims) >= 2:
        dims[-2] = _round_up(dims[-2], 8 * max(1, 4 // itemsize))  # sublane dim
    n = 1
    for d in dims:
        n *= d
    return n * itemsize


def _vmem_limit(in_blocks, out_blocks, headroom=16 << 20):
    # Count 2x for every BlockSpec'd operand: the pipeline double-buffers even
    # blocks with a constant index_map (weights / scale / bias).
    total = sum(2 * _padded_block_bytes(s, d) for s, d in in_blocks + out_blocks)
    return int(min(total + headroom, 64 << 20))


# ----------------------------- Pallas kernels ------------------------------ #
def _conv_small_cin_kernel(x_ref, w_ref, s_ref, b_ref, o_ref, *, kh, kw, wp, l_out):
    """Stem path (small Cin): lanes = flattened padded spatial, sublanes = channels.

    x_ref: (1, Cin, Lpad)      bf16  zero-padded flattened image (lane-dense)
    w_ref: (kh*kw, OCp, Cin)   bf16  raw conv weights, one kernel tap per index
    s_ref: (OCp, 1)            f32   BN scale  (gamma / sqrt(var + eps))
    b_ref: (OCp, 1)            f32   BN bias   (beta - mean * scale)
    o_ref: (1, OCp, l_out)     bf16  stride-1 output over the padded width (NC(HW))
    """
    acc = jnp.zeros(o_ref.shape[1:], jnp.float32)                  # (OCp, l_out)
    # kh*kw is small (<= 9 here): keep the tap loop unrolled; there is no
    # per-output-row loop at all (shifted full-width lane slices feed the MXU).
    for i in range(kh):
        for j in range(kw):
            off = i * wp + j
            lhs = w_ref[i * kw + j]                                 # (OCp, Cin)
            rhs = x_ref[0, :, pl.ds(off, l_out)]                    # (Cin, l_out)
            acc = acc + jnp.dot(lhs, rhs, preferred_element_type=jnp.float32)
    y = acc * s_ref[...] + b_ref[...]                               # f32 BN epilogue
    o_ref[0] = jnp.maximum(y, 0.0).astype(o_ref.dtype)              # ReLU, bf16 store


def _conv_big_cin_kernel(x_ref, w_ref, s_ref, b_ref, o_ref, *, kh, kw, wp, l_out):
    """Body path (Cin >= 128): lanes = Cin (MXU contraction depth), sublanes = spatial.

    x_ref: (1, Lpad, Cin)      bf16
    w_ref: (kh*kw, Cin, OCp)   bf16
    s_ref: (1, OCp)            f32
    b_ref: (1, OCp)            f32
    o_ref: (1, l_out, OCp)     bf16
    """
    acc = jnp.zeros(o_ref.shape[1:], jnp.float32)                   # (l_out, OCp)
    for i in range(kh):
        for j in range(kw):
            off = i * wp + j
            lhs = x_ref[0, pl.ds(off, l_out), :]                     # (l_out, Cin)
            acc = acc + jnp.dot(lhs, w_ref[i * kw + j],
                                preferred_element_type=jnp.float32)
    y = acc * s_ref[...] + b_ref[...]
    o_ref[0] = jnp.maximum(y, 0.0).astype(o_ref.dtype)


# ------------------------------ host-side glue ----------------------------- #
def basic_conv2d(x_nchw, params, *, stride, padding):
    """Conv2d(bias=False) + BatchNorm2d(eps=1e-3, inference) + ReLU.

    Input NCHW float32, output NCHW bfloat16 (cast at the call site if f32 is
    required by the consumer).
    """
    w = params["conv_w"]                      # [OC, IC, KH, KW]  (PyTorch layout)
    gamma, beta = params["bn_gamma"], params["bn_beta"]
    mean, var = params["bn_mean"], params["bn_var"]
    eps = 1e-3

    OC, IC, KH, KW = w.shape
    N, C, H, W = x_nchw.shape
    assert C == IC

    OH = (H + 2 * padding - KH) // stride + 1
    OW = (W + 2 * padding - KW) // stride + 1
    Hp, Wp = H + 2 * padding, W + 2 * padding
    OHf, OWf = Hp - KH + 1, Wp - KW + 1        # stride-1 ("full") output extents
    max_off = (KH - 1) * Wp + (KW - 1)         # largest shift used by any tap
    taps = KH * KW

    # BN (inference, running stats) -> per-channel f32 scale & bias, applied to
    # the f32 accumulator inside the kernel (NOT folded into bf16 weights).
    scale = (gamma / jnp.sqrt(var + eps)).astype(jnp.float32)
    bias = (beta - mean * scale).astype(jnp.float32)

    x_pad = jnp.pad(x_nchw, ((0, 0), (0, 0),
                             (padding, padding), (padding, padding)))

    if IC >= 128:
        # ------- body layers: lanes = Cin (full MXU depth), sublanes = spatial -------
        OCp = _round_up(OC, 128)               # TODO(synk): pad to 256 on v6e/v7x when OC > 128
        l_out = OHf * Wp
        Lpad = _round_up(max_off + l_out, 8)
        x_flat = jnp.transpose(x_pad, (0, 2, 3, 1)).reshape(N, Hp * Wp, IC)
        x_flat = jnp.pad(x_flat, ((0, 0), (0, Lpad - Hp * Wp), (0, 0))
                         ).astype(jnp.bfloat16)
        # [OC, IC, KH, KW] -> (taps, IC, OCp), raw conv weights in bf16.
        w_t = jnp.transpose(w, (2, 3, 1, 0)).reshape(taps, IC, OC)
        w_t = jnp.pad(w_t, ((0, 0), (0, 0), (0, OCp - OC))).astype(jnp.bfloat16)
        s_p = jnp.pad(scale, (0, OCp - OC)).reshape(1, OCp)
        b_p = jnp.pad(bias, (0, OCp - OC)).reshape(1, OCp)

        kernel = functools.partial(_conv_big_cin_kernel,
                                   kh=KH, kw=KW, wp=Wp, l_out=l_out)
        in_blocks = [((1, Lpad, IC), jnp.bfloat16),
                     ((taps, IC, OCp), jnp.bfloat16),
                     ((1, OCp), jnp.float32), ((1, OCp), jnp.float32)]
        out_blocks = [((1, l_out, OCp), jnp.bfloat16)]
        out = pl.pallas_call(
            kernel,
            out_shape=jax.ShapeDtypeStruct((N, l_out, OCp), jnp.bfloat16),
            grid_spec=pltpu.PrefetchScalarGridSpec(
                num_scalar_prefetch=0,
                grid=(N,),
                in_specs=[
                    pl.BlockSpec((1, Lpad, IC), lambda n: (n, 0, 0)),
                    pl.BlockSpec((taps, IC, OCp), lambda n: (0, 0, 0)),
                    pl.BlockSpec((1, OCp), lambda n: (0, 0)),
                    pl.BlockSpec((1, OCp), lambda n: (0, 0)),
                ],
                out_specs=pl.BlockSpec((1, l_out, OCp), lambda n: (n, 0, 0)),
            ),
            compiler_params=pltpu.CompilerParams(
                dimension_semantics=("parallel",),
                vmem_limit_bytes=_vmem_limit(in_blocks, out_blocks)),
        )(x_flat, w_t, s_p, b_p)
        out_full = out[:, :, :OC].reshape(N, OHf, Wp, OC)
        out_full = jnp.transpose(out_full, (0, 3, 1, 2))    # NHWC -> NCHW
    else:
        # ------- stem layers (small Cin): lanes = flat spatial (dense), sublanes = chans -------
        OCp = _round_up(OC, 16)
        l_out = _round_up(OHf * Wp, 128)       # lane-dense output -> unmasked stores
        Lpad = _round_up(max_off + l_out, 128)
        x_flat = x_pad.reshape(N, IC, Hp * Wp)
        x_flat = jnp.pad(x_flat, ((0, 0), (0, 0), (0, Lpad - Hp * Wp))
                         ).astype(jnp.bfloat16)
        # [OC, IC, KH, KW] -> (taps, OCp, IC), raw conv weights in bf16.
        w_t = jnp.transpose(w, (2, 3, 0, 1)).reshape(taps, OC, IC)
        w_t = jnp.pad(w_t, ((0, 0), (0, OCp - OC), (0, 0))).astype(jnp.bfloat16)
        s_p = jnp.pad(scale, (0, OCp - OC)).reshape(OCp, 1)
        b_p = jnp.pad(bias, (0, OCp - OC)).reshape(OCp, 1)

        kernel = functools.partial(_conv_small_cin_kernel,
                                   kh=KH, kw=KW, wp=Wp, l_out=l_out)
        in_blocks = [((1, IC, Lpad), jnp.bfloat16),
                     ((taps, OCp, IC), jnp.bfloat16),
                     ((OCp, 1), jnp.float32), ((OCp, 1), jnp.float32)]
        out_blocks = [((1, OCp, l_out), jnp.bfloat16)]
        out = pl.pallas_call(
            kernel,
            out_shape=jax.ShapeDtypeStruct((N, OCp, l_out), jnp.bfloat16),
            grid_spec=pltpu.PrefetchScalarGridSpec(
                num_scalar_prefetch=0,
                grid=(N,),
                in_specs=[
                    pl.BlockSpec((1, IC, Lpad), lambda n: (n, 0, 0)),
                    pl.BlockSpec((taps, OCp, IC), lambda n: (0, 0, 0)),
                    pl.BlockSpec((OCp, 1), lambda n: (0, 0)),
                    pl.BlockSpec((OCp, 1), lambda n: (0, 0)),
                ],
                out_specs=pl.BlockSpec((1, OCp, l_out), lambda n: (n, 0, 0)),
            ),
            compiler_params=pltpu.CompilerParams(
                dimension_semantics=("parallel",),
                vmem_limit_bytes=_vmem_limit(in_blocks, out_blocks)),
        )(x_flat, w_t, s_p, b_p)
        # Already channel-major: NCHW with the padded width, no transpose needed.
        out_full = out[:, :OC, :OHf * Wp].reshape(N, OC, OHf, Wp)

    # Drop the padded columns and decimate to the requested stride.
    out_nchw = out_full[:, :, : (OH - 1) * stride + 1 : stride,
                        : (OW - 1) * stride + 1 : stride]
    return out_nchw


def init_params(key, in_planes, out_planes, kernel_size, w_scale=0.1):
    k_w, k_g, k_b, k_m, k_v = jax.random.split(key, 5)
    conv_w = jax.random.normal(
        k_w, (out_planes, in_planes, kernel_size, kernel_size), jnp.float32) * w_scale
    return {
        "conv_w": conv_w,
        "bn_gamma": 1.0 + 0.1 * jax.random.normal(k_g, (out_planes,), jnp.float32),
        "bn_beta": 0.1 * jax.random.normal(k_b, (out_planes,), jnp.float32),
        "bn_mean": 0.1 * jax.random.normal(k_m, (out_planes,), jnp.float32),
        "bn_var": jnp.abs(jax.random.normal(k_v, (out_planes,), jnp.float32)) + 0.5,
    }


def _reference(x_nchw, params, *, stride, padding):
    # Pure-JAX f32 reference (XLA conv), inference-mode BN.
    # TODO(synk): training-mode BatchNorm (batch stats + running-stat update) not implemented.
    eps = 1e-3
    y = jax.lax.conv_general_dilated(
        x_nchw, params["conv_w"],
        window_strides=(stride, stride),
        padding=[(padding, padding), (padding, padding)],
        dimension_numbers=("NCHW", "OIHW", "NCHW"))
    scale = params["bn_gamma"] / jnp.sqrt(params["bn_var"] + eps)
    bias = params["bn_beta"] - params["bn_mean"] * scale
    y = y * scale[None, :, None, None] + bias[None, :, None, None]
    return jnp.maximum(y, 0.0)


if __name__ == "__main__":
    key = jax.random.PRNGKey(0)
    k_x, k_p, k_x2, k_p2 = jax.random.split(key, 4)

    # -- Primary check: the spec shapes (small-Cin / stem path) ---------------
    # BasicConv2d(in_planes=4, out_planes=8, kernel_size=3, stride=1, padding=1)
    x = jax.random.normal(k_x, (2, 4, 16, 16), jnp.float32)        # NCHW, as PyTorch
    params = init_params(k_p, in_planes=4, out_planes=8, kernel_size=3)
    fwd = jax.jit(functools.partial(basic_conv2d, stride=1, padding=1))
    out = fwd(x, params)
    jax.block_until_ready(out)
    assert out.shape == (2, 8, 16, 16)
    ref = _reference(x, params, stride=1, padding=1)
    # bf16 operands + bf16 output (f32 MXU accumulation, f32 BN epilogue).
    assert jnp.allclose(out.astype(jnp.float32), ref, atol=5e-2, rtol=5e-2), \
        "small-Cin path mismatch vs reference"

    # -- Secondary check: large-Cin path (per-tap accumulating GEMMs) ---------
    x2 = jax.random.normal(k_x2, (1, 128, 8, 8), jnp.float32)
    params2 = init_params(k_p2, in_planes=128, out_planes=32, kernel_size=3)
    fwd2 = jax.jit(functools.partial(basic_conv2d, stride=1, padding=1))
    out2 = fwd2(x2, params2)
    jax.block_until_ready(out2)
    assert out2.shape == (1, 32, 8, 8)
    # Compare against the reference evaluated on bf16-rounded operands so this
    # check isolates kernel correctness from bf16 input/weight quantization.
    params2_bf = dict(params2)
    params2_bf["conv_w"] = params2["conv_w"].astype(jnp.bfloat16).astype(jnp.float32)
    ref2 = _reference(x2.astype(jnp.bfloat16).astype(jnp.float32), params2_bf,
                      stride=1, padding=1)
    assert jnp.allclose(out2.astype(jnp.float32), ref2, atol=2e-2, rtol=2e-2), \
        "large-Cin path mismatch vs reference"

    print("KERNEL_OK")
</pallas_src>

<mosaic_0001>
module attributes {stable_mosaic.version = 11 : i64} {
  func.func @_conv_small_cin_kernel(%arg0: i32, %arg1: memref<1x4x512xbf16, #tpu.memory_space<vmem>>, %arg2: memref<9x16x4xbf16, #tpu.memory_space<vmem>>, %arg3: memref<16x1xf32, #tpu.memory_space<vmem>>, %arg4: memref<16x1xf32, #tpu.memory_space<vmem>>, %arg5: memref<1x16x384xbf16, #tpu.memory_space<vmem>>) attributes {dimension_semantics = [#tpu.dimension_semantics<parallel>], iteration_bounds = array<i64: 2>, scalar_prefetch = 0 : i64, scratch_operands = 0 : i64, tpu.core_type = #tpu.core_type<tc>, window_params = [{transform_indices = @transform_0, window_bounds = array<i64: 1, 4, 512>}, {pipeline_mode = #tpu.pipeline_mode<synchronous>, transform_indices = @transform_1, window_bounds = array<i64: 9, 16, 4>}, {pipeline_mode = #tpu.pipeline_mode<synchronous>, transform_indices = @transform_2, window_bounds = array<i64: 16, 1>}, {pipeline_mode = #tpu.pipeline_mode<synchronous>, transform_indices = @transform_3, window_bounds = array<i64: 16, 1>}, {transform_indices = @transform_4, window_bounds = array<i64: 1, 16, 384>}]} {
    %cst = arith.constant 0.000000e+00 : f32
    %0 = vector.broadcast %cst : f32 to vector<16x384xf32>
    %c0 = arith.constant 0 : index
    %c0_0 = arith.constant 0 : index
    %c0_1 = arith.constant 0 : index
    %1 = vector.load %arg2[%c0, %c0_0, %c0_1] : memref<9x16x4xbf16, #tpu.memory_space<vmem>>, vector<1x16x4xbf16>
    %2 = vector.shape_cast %1 : vector<1x16x4xbf16> to vector<16x4xbf16>
    %c0_2 = arith.constant 0 : index
    %c0_3 = arith.constant 0 : index
    %c0_4 = arith.constant 0 : index
    %3 = vector.load %arg1[%c0_2, %c0_3, %c0_4] : memref<1x4x512xbf16, #tpu.memory_space<vmem>>, vector<1x4x384xbf16>
    %4 = vector.shape_cast %3 : vector<1x4x384xbf16> to vector<4x384xbf16>
    %cst_5 = arith.constant dense<0.000000e+00> : vector<16x384xf32>
    %5 = tpu.matmul %2, %4, %cst_5 {dimension_numbers = #tpu.dot_dimension_numbers<[1], [0], [0], [1], [0, 0, 1, 1], [], []>} : vector<16x4xbf16>, vector<4x384xbf16>, vector<16x384xf32> -> vector<16x384xf32>
    %6 = arith.addf %0, %5 : vector<16x384xf32>
    %c1 = arith.constant 1 : index
    %c0_6 = arith.constant 0 : index
    %c0_7 = arith.constant 0 : index
    %7 = vector.load %arg2[%c1, %c0_6, %c0_7] : memref<9x16x4xbf16, #tpu.memory_space<vmem>>, vector<1x16x4xbf16>
    %8 = vector.shape_cast %7 : vector<1x16x4xbf16> to vector<16x4xbf16>
    %c0_8 = arith.constant 0 : index
    %c0_9 = arith.constant 0 : index
    %c1_10 = arith.constant 1 : index
    %9 = vector.load %arg1[%c0_8, %c0_9, %c1_10] : memref<1x4x512xbf16, #tpu.memory_space<vmem>>, vector<1x4x384xbf16>
    %10 = vector.shape_cast %9 : vector<1x4x384xbf16> to vector<4x384xbf16>
    %cst_11 = arith.constant dense<0.000000e+00> : vector<16x384xf32>
    %11 = tpu.matmul %8, %10, %cst_11 {dimension_numbers = #tpu.dot_dimension_numbers<[1], [0], [0], [1], [0, 0, 1, 1], [], []>} : vector<16x4xbf16>, vector<4x384xbf16>, vector<16x384xf32> -> vector<16x384xf32>
    %12 = arith.addf %6, %11 : vector<16x384xf32>
    %c2 = arith.constant 2 : index
    %c0_12 = arith.constant 0 : index
    %c0_13 = arith.constant 0 : index
    %13 = vector.load %arg2[%c2, %c0_12, %c0_13] : memref<9x16x4xbf16, #tpu.memory_space<vmem>>, vector<1x16x4xbf16>
    %14 = vector.shape_cast %13 : vector<1x16x4xbf16> to vector<16x4xbf16>
    %c0_14 = arith.constant 0 : index
    %c0_15 = arith.constant 0 : index
    %c2_16 = arith.constant 2 : index
    %15 = vector.load %arg1[%c0_14, %c0_15, %c2_16] : memref<1x4x512xbf16, #tpu.memory_space<vmem>>, vector<1x4x384xbf16>
    %16 = vector.shape_cast %15 : vector<1x4x384xbf16> to vector<4x384xbf16>
    %cst_17 = arith.constant dense<0.000000e+00> : vector<16x384xf32>
    %17 = tpu.matmul %14, %16, %cst_17 {dimension_numbers = #tpu.dot_dimension_numbers<[1], [0], [0], [1], [0, 0, 1, 1], [], []>} : vector<16x4xbf16>, vector<4x384xbf16>, vector<16x384xf32> -> vector<16x384xf32>
    %18 = arith.addf %12, %17 : vector<16x384xf32>
    %c3 = arith.constant 3 : index
    %c0_18 = arith.constant 0 : index
    %c0_19 = arith.constant 0 : index
    %19 = vector.load %arg2[%c3, %c0_18, %c0_19] : memref<9x16x4xbf16, #tpu.memory_space<vmem>>, vector<1x16x4xbf16>
    %20 = vector.shape_cast %19 : vector<1x16x4xbf16> to vector<16x4xbf16>
    %c0_20 = arith.constant 0 : index
    %c0_21 = arith.constant 0 : index
    %c18 = arith.constant 18 : index
    %21 = vector.load %arg1[%c0_20, %c0_21, %c18] : memref<1x4x512xbf16, #tpu.memory_space<vmem>>, vector<1x4x384xbf16>
    %22 = vector.shape_cast %21 : vector<1x4x384xbf16> to vector<4x384xbf16>
    %cst_22 = arith.constant dense<0.000000e+00> : vector<16x384xf32>
    %23 = tpu.matmul %20, %22, %cst_22 {dimension_numbers = #tpu.dot_dimension_numbers<[1], [0], [0], [1], [0, 0, 1, 1], [], []>} : vector<16x4xbf16>, vector<4x384xbf16>, vector<16x384xf32> -> vector<16x384xf32>
    %24 = arith.addf %18, %23 : vector<16x384xf32>
    %c4 = arith.constant 4 : index
    %c0_23 = arith.constant 0 : index
    %c0_24 = arith.constant 0 : index
    %25 = vector.load %arg2[%c4, %c0_23, %c0_24] : memref<9x16x4xbf16, #tpu.memory_space<vmem>>, vector<1x16x4xbf16>
    %26 = vector.shape_cast %25 : vector<1x16x4xbf16> to vector<16x4xbf16>
    %c0_25 = arith.constant 0 : index
    %c0_26 = arith.constant 0 : index
    %c19 = arith.constant 19 : index
    %27 = vector.load %arg1[%c0_25, %c0_26, %c19] : memref<1x4x512xbf16, #tpu.memory_space<vmem>>, vector<1x4x384xbf16>
    %28 = vector.shape_cast %27 : vector<1x4x384xbf16> to vector<4x384xbf16>
    %cst_27 = arith.constant dense<0.000000e+00> : vector<16x384xf32>
    %29 = tpu.matmul %26, %28, %cst_27 {dimension_numbers = #tpu.dot_dimension_numbers<[1], [0], [0], [1], [0, 0, 1, 1], [], []>} : vector<16x4xbf16>, vector<4x384xbf16>, vector<16x384xf32> -> vector<16x384xf32>
    %30 = arith.addf %24, %29 : vector<16x384xf32>
    %c5 = arith.constant 5 : index
    %c0_28 = arith.constant 0 : index
    %c0_29 = arith.constant 0 : index
    %31 = vector.load %arg2[%c5, %c0_28, %c0_29] : memref<9x16x4xbf16, #tpu.memory_space<vmem>>, vector<1x16x4xbf16>
    %32 = vector.shape_cast %31 : vector<1x16x4xbf16> to vector<16x4xbf16>
    %c0_30 = arith.constant 0 : index
    %c0_31 = arith.constant 0 : index
    %c20 = arith.constant 20 : index
    %33 = vector.load %arg1[%c0_30, %c0_31, %c20] : memref<1x4x512xbf16, #tpu.memory_space<vmem>>, vector<1x4x384xbf16>
    %34 = vector.shape_cast %33 : vector<1x4x384xbf16> to vector<4x384xbf16>
    %cst_32 = arith.constant dense<0.000000e+00> : vector<16x384xf32>
    %35 = tpu.matmul %32, %34, %cst_32 {dimension_numbers = #tpu.dot_dimension_numbers<[1], [0], [0], [1], [0, 0, 1, 1], [], []>} : vector<16x4xbf16>, vector<4x384xbf16>, vector<16x384xf32> -> vector<16x384xf32>
    %36 = arith.addf %30, %35 : vector<16x384xf32>
    %c6 = arith.constant 6 : index
    %c0_33 = arith.constant 0 : index
    %c0_34 = arith.constant 0 : index
    %37 = vector.load %arg2[%c6, %c0_33, %c0_34] : memref<9x16x4xbf16, #tpu.memory_space<vmem>>, vector<1x16x4xbf16>
    %38 = vector.shape_cast %37 : vector<1x16x4xbf16> to vector<16x4xbf16>
    %c0_35 = arith.constant 0 : index
    %c0_36 = arith.constant 0 : index
    %c36 = arith.constant 36 : index
    %39 = vector.load %arg1[%c0_35, %c0_36, %c36] : memref<1x4x512xbf16, #tpu.memory_space<vmem>>, vector<1x4x384xbf16>
    %40 = vector.shape_cast %39 : vector<1x4x384xbf16> to vector<4x384xbf16>
    %cst_37 = arith.constant dense<0.000000e+00> : vector<16x384xf32>
    %41 = tpu.matmul %38, %40, %cst_37 {dimension_numbers = #tpu.dot_dimension_numbers<[1], [0], [0], [1], [0, 0, 1, 1], [], []>} : vector<16x4xbf16>, vector<4x384xbf16>, vector<16x384xf32> -> vector<16x384xf32>
    %42 = arith.addf %36, %41 : vector<16x384xf32>
    %c7 = arith.constant 7 : index
    %c0_38 = arith.constant 0 : index
    %c0_39 = arith.constant 0 : index
    %43 = vector.load %arg2[%c7, %c0_38, %c0_39] : memref<9x16x4xbf16, #tpu.memory_space<vmem>>, vector<1x16x4xbf16>
    %44 = vector.shape_cast %43 : vector<1x16x4xbf16> to vector<16x4xbf16>
    %c0_40 = arith.constant 0 : index
    %c0_41 = arith.constant 0 : index
    %c37 = arith.constant 37 : index
    %45 = vector.load %arg1[%c0_40, %c0_41, %c37] : memref<1x4x512xbf16, #tpu.memory_space<vmem>>, vector<1x4x384xbf16>
    %46 = vector.shape_cast %45 : vector<1x4x384xbf16> to vector<4x384xbf16>
    %cst_42 = arith.constant dense<0.000000e+00> : vector<16x384xf32>
    %47 = tpu.matmul %44, %46, %cst_42 {dimension_numbers = #tpu.dot_dimension_numbers<[1], [0], [0], [1], [0, 0, 1, 1], [], []>} : vector<16x4xbf16>, vector<4x384xbf16>, vector<16x384xf32> -> vector<16x384xf32>
    %48 = arith.addf %42, %47 : vector<16x384xf32>
    %c8 = arith.constant 8 : index
    %c0_43 = arith.constant 0 : index
    %c0_44 = arith.constant 0 : index
    %49 = vector.load %arg2[%c8, %c0_43, %c0_44] : memref<9x16x4xbf16, #tpu.memory_space<vmem>>, vector<1x16x4xbf16>
    %50 = vector.shape_cast %49 : vector<1x16x4xbf16> to vector<16x4xbf16>
    %c0_45 = arith.constant 0 : index
    %c0_46 = arith.constant 0 : index
    %c38 = arith.constant 38 : index
    %51 = vector.load %arg1[%c0_45, %c0_46, %c38] : memref<1x4x512xbf16, #tpu.memory_space<vmem>>, vector<1x4x384xbf16>
    %52 = vector.shape_cast %51 : vector<1x4x384xbf16> to vector<4x384xbf16>
    %cst_47 = arith.constant dense<0.000000e+00> : vector<16x384xf32>
    %53 = tpu.matmul %50, %52, %cst_47 {dimension_numbers = #tpu.dot_dimension_numbers<[1], [0], [0], [1], [0, 0, 1, 1], [], []>} : vector<16x4xbf16>, vector<4x384xbf16>, vector<16x384xf32> -> vector<16x384xf32>
    %54 = arith.addf %48, %53 : vector<16x384xf32>
    %c0_48 = arith.constant 0 : index
    %c0_49 = arith.constant 0 : index
    %55 = vector.load %arg3[%c0_48, %c0_49] : memref<16x1xf32, #tpu.memory_space<vmem>>, vector<16x1xf32>
    %56 = vector.broadcast %55 : vector<16x1xf32> to vector<16x384xf32>
    %57 = arith.mulf %54, %56 : vector<16x384xf32>
    %c0_50 = arith.constant 0 : index
    %c0_51 = arith.constant 0 : index
    %58 = vector.load %arg4[%c0_50, %c0_51] : memref<16x1xf32, #tpu.memory_space<vmem>>, vector<16x1xf32>
    %59 = vector.broadcast %58 : vector<16x1xf32> to vector<16x384xf32>
    %60 = arith.addf %57, %59 : vector<16x384xf32>
    %cst_52 = arith.constant 0.000000e+00 : f32
    %61 = vector.broadcast %cst_52 : f32 to vector<16x384xf32>
    %62 = arith.maximumf %60, %61 : vector<16x384xf32>
    %63 = arith.truncf %62 : vector<16x384xf32> to vector<16x384xbf16>
    %c0_53 = arith.constant 0 : index
    %c0_54 = arith.constant 0 : index
    %c0_55 = arith.constant 0 : index
    %64 = vector.load %arg5[%c0_53, %c0_54, %c0_55] : memref<1x16x384xbf16, #tpu.memory_space<vmem>>, vector<1x16x384xbf16>
    %65 = vector.shape_cast %64 : vector<1x16x384xbf16> to vector<16x384xbf16>
    %66 = vector.shape_cast %63 : vector<16x384xbf16> to vector<1x16x384xbf16>
    tpu.vector_store %arg5[%c0_53, %c0_54, %c0_55], %66 {strides = array<i32>} : memref<1x16x384xbf16, #tpu.memory_space<vmem>>, vector<1x16x384xbf16>,
    return
  }
  func.func @transform_0(%arg0: i32) -> (i32, i32, i32) {
    %c0_i32 = arith.constant 0 : i32
    %c0_i32_0 = arith.constant 0 : i32
    %c0_i32_1 = arith.constant 0 : i32
    return %arg0, %c0_i32, %c0_i32_0 : i32, i32, i32
  }
  func.func @transform_1(%arg0: i32) -> (i32, i32, i32) {
    %c0_i32 = arith.constant 0 : i32
    %c0_i32_0 = arith.constant 0 : i32
    %c0_i32_1 = arith.constant 0 : i32
    %c0_i32_2 = arith.constant 0 : i32
    return %c0_i32, %c0_i32_0, %c0_i32_1 : i32, i32, i32
  }
  func.func @transform_2(%arg0: i32) -> (i32, i32) {
    %c0_i32 = arith.constant 0 : i32
    %c0_i32_0 = arith.constant 0 : i32
    %c0_i32_1 = arith.constant 0 : i32
    return %c0_i32, %c0_i32_0 : i32, i32
  }
  func.func @transform_3(%arg0: i32) -> (i32, i32) {
    %c0_i32 = arith.constant 0 : i32
    %c0_i32_0 = arith.constant 0 : i32
    %c0_i32_1 = arith.constant 0 : i32
    return %c0_i32, %c0_i32_0 : i32, i32
  }
  func.func @transform_4(%arg0: i32) -> (i32, i32, i32) {
    %c0_i32 = arith.constant 0 : i32
    %c0_i32_0 = arith.constant 0 : i32
    %c0_i32_1 = arith.constant 0 : i32
    return %arg0, %c0_i32, %c0_i32_0 : i32, i32, i32
  }
}

</mosaic_0001>

<bundles_post_ra>
// kernel: basic_conv2d.1
= control target key start
LH: loop header
LB: loop body
LE: loop exit
PB: predicated region body
PF: predicated region fallthrough
CT: control target
= control target key end

     0   :  { %s1851_s15 = smov 0   ;;  %s2023_s0 = inlined_call_operand.vmem [shape: bf16[2,4,512], index: 0, kind: input, shape index: {}]   ;;  %s2024_s1 = inlined_call_operand.vmem [shape: bf16[9,16,4], index: 1, kind: input, shape index: {}]   ;;  %s2025_s2 = inlined_call_operand.vmem [shape: f32[16,1], index: 2, kind: input, shape index: {}]   ;;  %s2026_s3 = inlined_call_operand.vmem [shape: f32[16,1], index: 3, kind: input, shape index: {}]   ;;  %s2027_s4 = inlined_call_operand.vmem [shape: bf16[2,16,384], index: 4, kind: output, shape index: {}]  }
   0x1 LB: > { %s1565_s16 = sadd.s32 4294967295, %s1812_s15   ;;  %p1569_p0 = scmp.ge.s32.totalorder %s1812_s15, 1  ;;  %s1812_s15 = sphi %s1851_s15, %s14_s15  }
   0x2   : > { %p162_p1 = scmp.lt.s32.totalorder %s1812_s15, 3 }
   0x4   : > { %p163_p2 = pnand %p1569_p0, %p162_p1 }
   0x5   : > { %p188_p3 = scmp.lt.s32.totalorder (!%p163_p2), %s1565_s16, 1  ;;  %v216_v0 = vlaneseq (!%p163_p2)  ;;  %v1814_v1 = vmov (!%p163_p2), 1983009808   ;;  %v1815_v5 = vmov (!%p163_p2), 0.0   ;;  %v1816_v6 = vmov (!%p163_p2), 0   ;;  %s1818_s21 = smov (!%p163_p2), 127  }
   0x6   : > { %166 = sbr.rel (%p163_p2) target bundleno = 464 (0x1d0), region = 36  ;;  %v214_v2 = vunpack.c.l.s4 (!%p163_p2), %v1814_v1  ;;  %1654 = vmatprep.subr.bf16.mxu1 (!%p163_p2), %v1815_v5  ;;  %287 = vmatprep.mubr.bf16.mxu0 (!%p163_p2), %v1816_v6  ;;  %vm1817_vm0 = vmmov (!%p163_p2), 0   ;;  %s1819_s22 = smov (!%p163_p2), 126   ;;  %v1445_v18 = vld [vmem:[%s2025_s2 + $0x8] sm:$0xff] (!%p163_p2)  ;;  %v1444_v19 = vld [vmem:[%s2025_s2] sm:$0xff] (!%p163_p2)  ;;  %vm237_vm1 = vcmask (!%p163_p2), 1039360  }
   0x7   : > { %v217_v3 = vshrl.u32 (!%p163_p2), %v216_v0, 7  ;;  %1794 = vset.pattern.permute.xlu1 (!%p163_p2), %v1816_v6  ;;  %1793 = vset.pattern.permute.xlu0 (!%p163_p2), %v1816_v6  ;;  %s1820_s23 = smov (!%p163_p2), 110   ;;  %s1821_s24 = smov (!%p163_p2), 109   ;;  %v1462_v20 = vld [vmem:[%s2026_s3] sm:$0xff] (!%p163_p2)  ;;  %v1463_v21 = vld [vmem:[%s2026_s3 + $0x8] sm:$0xff] (!%p163_p2)  ;;  %vm245_vm2 = vcmask (!%p163_p2), 1041408  }
   0x8   : > { %v215_v4 = vunpack.c.0.s8 (!%p163_p2), %v214_v2  ;;  %1656 = vmatprep.mubr.msk.bf16.mxu1 (!%p163_p2), %vm1817_vm0, %v1815_v5  ;;  %s1822_s25 = smov (!%p163_p2), 108   ;;  %s1823_s26 = smov (!%p163_p2), 92   ;;  %v1796_v30 = vld [vmem:[%s2024_s1 + $0x8] sm:$0xff] (!%p163_p2)   ;;  %vm241_vm3 = vcmask (!%p163_p2), 31744   ;;  %vm492_vm4 = vcmask (!%p163_p2), 1031168   ;;  %v1798_v42 = vld [vmem:[%s2024_s1] sm:$0xff] (!%p163_p2)  }
   0x9   : > { %s1824_s27 = smov (!%p163_p2), 91   ;;  %s1825_s28 = smov (!%p163_p2), 90   ;;  %vm633_vm5 = vcmask (!%p163_p2), 900096   ;;  %v1799_v52 = vld [vmem:[%s2024_s1 + $0x10] sm:$0xff] (!%p163_p2)   ;;  %vm774_vm6 = vcmask (!%p163_p2), 891904   ;;  %v1800_v62 = vld [vmem:[%s2024_s1 + $0x18] sm:$0xff] (!%p163_p2)  }
   0xa   : > { %v218_v7 = vsub.s32 (!%p163_p2), %v215_v4, %v217_v3  ;;  %vm915_vm7 = vcmask (!%p163_p2), 883712   ;;  %vm1056_vm8 = vcmask (!%p163_p2), 752640   ;;  %vm1197_vm9 = vcmask (!%p163_p2), 744448  }
   0xb   : > { %vm1338_vm10 = vcmask (!%p163_p2), 736256  }
   0xd   : > { %s2029_s16 = smov (!%p188_p3, %s1565_s16), 1 }
   0xe   : > { %s1631_s17 = sshll.u32 %s2029_s16, 3  ;;  %s1772_s5 = smul.u32 24, %s2029_s16 }
   0xf   : > { %s192_s20 = scalar_lea.vmem %s2023_s0, %s1631_s17 }
  0x10   : > { %v205_v8 = vld [vmem:[%s192_s20] sm:$0xff]  ;;  %s197_s16 = scalar_lea.vmem %s2027_s4, %s1772_s5 }
  0x11   : > { %v201_v9 = vld [vmem:[%s192_s20] sm:$0x3f]  ;;  %v219_v10 = vrot.slane %v205_v8, %v218_v7  ;;  %v212_v11 = vcombine.high %v205_v8, %v205_v8 }
  0x12   : > { %v1871_v12 = vrot.slane %v201_v9, %v218_v7  ;;  %v345_v13 = vcombine.high %v201_v9, %v201_v9 }
  0x13   : > { %229 = vrot.lane.b32.xlu0 %v219_v10, %s1818_s21  ;;  %v227_v14 = vcombine.high %v219_v10, %v219_v10  ;;  %v226_v15 = vrot.slane %v212_v11, %v218_v7 }
  0x14   : > { %v1873_v16 = vrot.slane %v345_v13, %v218_v7  ;;  %v360_v25 = vcombine.high %v1871_v12, %v1871_v12  ;;  %v365_v33 = vsel %vm245_vm2, %v1871_v12, 0 }
  0x15   : > { %233 = vrot.lane.b32.xlu1 %v226_v15, %s1818_s21  ;;  %v228_v17 = vcombine.high %v226_v15, %v226_v15 }
  0x16   : > { %v371_v35 = vsel %vm245_vm2, %v1873_v16, 0 }
  0x17   : > { %231 = vrot.lane.b32.xlu0 %v227_v14, %s1818_s21 }
  0x19   : > { %235 = vrot.lane.b32.xlu1 %v228_v17, %s1818_s21 }
  0x1b   : > { %484 = vrot.lane.b32.xlu0 %v219_v10, %s1819_s22 }
  0x1d   : > { %486 = vrot.lane.b32.xlu1 %v227_v14, %s1819_s22 }
  0x1f   : > { %488 = vrot.lane.b32.xlu0 %v226_v15, %s1819_s22 }
  0x21   : > { %490 = vrot.lane.b32.xlu1 %v228_v17, %s1819_s22 }
  0x23   : > { %625 = vrot.lane.b32.xlu0 %v219_v10, %s1820_s23 }
  0x25   : > { %627 = vrot.lane.b32.xlu1 %v227_v14, %s1820_s23 }
  0x27   : > { %629 = vrot.lane.b32.xlu0 %v226_v15, %s1820_s23 }
  0x29   : > { %631 = vrot.lane.b32.xlu1 %v228_v17, %s1820_s23 }
  0x2b   : > { %766 = vrot.lane.b32.xlu0 %v219_v10, %s1821_s24 }
  0x2d   : > { %768 = vrot.lane.b32.xlu1 %v227_v14, %s1821_s24 }
  0x2f   : > { %770 = vrot.lane.b32.xlu0 %v226_v15, %s1821_s24 }
  0x31   : > { %772 = vrot.lane.b32.xlu1 %v228_v17, %s1821_s24 }
  0x33   : > { %907 = vrot.lane.b32.xlu0 %v219_v10, %s1822_s25 }
  0x35   : > { %909 = vrot.lane.b32.xlu1 %v227_v14, %s1822_s25 }
  0x37   : > { %911 = vrot.lane.b32.xlu0 %v226_v15, %s1822_s25 }
  0x39   : > { %913 = vrot.lane.b32.xlu1 %v228_v17, %s1822_s25 }
  0x3b   : > { %1048 = vrot.lane.b32.xlu0 %v219_v10, %s1823_s26 }
  0x3d   : > { %1050 = vrot.lane.b32.xlu1 %v227_v14, %s1823_s26 }
  0x3f   : > { %1052 = vrot.lane.b32.xlu0 %v226_v15, %s1823_s26 }
  0x41   : > { %1054 = vrot.lane.b32.xlu1 %v228_v17, %s1823_s26 }
  0x43   : > { %1189 = vrot.lane.b32.xlu0 %v219_v10, %s1824_s27 }
  0x45   : > { %1191 = vrot.lane.b32.xlu1 %v227_v14, %s1824_s27 }
  0x47   : > { %1193 = vrot.lane.b32.xlu0 %v226_v15, %s1824_s27 }
  0x49   : > { %1195 = vrot.lane.b32.xlu1 %v228_v17, %s1824_s27 }
  0x4b   : > { %1330 = vrot.lane.b32.xlu0 %v219_v10, %s1825_s28  ;;  %v1801_v10 = vld [vmem:[%s2024_s1 + $0x20] sm:$0xff]  }
  0x4d   : > { %1332 = vrot.lane.b32.xlu1 %v227_v14, %s1825_s28 }
  0x4f   : > { %1334 = vrot.lane.b32.xlu0 %v226_v15, %s1825_s28 }
  0x51   : > { %1336 = vrot.lane.b32.xlu1 %v228_v17, %s1825_s28 }
  0x53   : > { %1448 = vperm.xlu0 %1793, %v1444_v19  }
  0x55   : > { %1453 = vperm.xlu1 %1794, %v1445_v18  }
  0x57   : > { %1471 = vperm.xlu0 %1793, %v1463_v21  }
  0x59   : > { %1466 = vperm.xlu1 %1794, %v1462_v20   ;;  %v1802_v20 = vld [vmem:[%s2024_s1 + $0x28] sm:$0xff]  }
  0x85   : > { %v230_v22 = vpop.permute.xlu0 %229 }
  0x87   : > { %v234_v23 = vpop.permute.xlu1 %233 }
  0x89   : > { %v232_v24 = vpop.permute.xlu0 %231 }
  0x8a   : > { %v239_v26 = vsel %vm237_vm1, %v232_v24, %v234_v23  ;;  %v238_v27 = vsel %vm237_vm1, %v230_v22, %v232_v24 }
  0x8b   : > { %1576 = vmatprep.subr.msk.bf16.mxu0 %vm245_vm2, %v239_v26  ;;  %v236_v28 = vpop.permute.xlu1 %235  ;;  %v247_v29 = vsel %vm245_vm2, %v238_v27, 0 }
  0x8c   : > { %256 = vmatpush1.bf16.msra.mxu0 %v247_v29  ;;  %v240_v31 = vsel %vm237_vm1, %v234_v23, %v236_v28 }
  0x8d   : > { %v253_v32 = vsel %vm245_vm2, %v240_v31, 0  ;;  %1580 = vmatprep.subr.msk.bf16.mxu0 %vm245_vm2, %v360_v25  ;;  %v485_v34 = vpop.permute.xlu0 %484 }
  0x8e   : > { %1655 = vmatpush3.bf16.msra.mxu1 %v253_v32 }
  0x8f   : > { %1577 = vmatmul.mubr.msk.bf16.vlgmr.msra.gmra.mrb[0].mxu0 %vm241_vm3, %v1796_v30  ;;  %1660 = vmatprep.subr.bf16.mxu1 %v1815_v5  ;;  %v487_v36 = vpop.permute.xlu1 %486 }
  0x90   : > { %374 = vmatpush1.bf16.msra.mxu0 %v365_v33  ;;  %405 = vmatprep.mubr.bf16.mxu0 %v1816_v6  ;;  %v493_v41 = vsel %vm492_vm4, %v485_v34, %v487_v36 }
  0x91   : > { %1657 = vmatmul.mubr.msk.bf16.vlgmr.msra.gmra.mrb[0].mxu1 %vm241_vm3, %v1796_v30  ;;  %v489_v37 = vpop.permute.xlu0 %488  ;;  %v500_v45 = vsel %vm245_vm2, %v493_v41, 0  ;;  %v1803_v30 = vld [vmem:[%s2024_s1 + $0x30] sm:$0xff]  }
  0x92   : > { %1661 = vmatpush3.bf16.msra.mxu1 %v371_v35  ;;  %v494_v38 = vsel %vm492_vm4, %v487_v36, %v489_v37  ;;  %1662 = vmatprep.mubr.msk.bf16.mxu1 %vm1817_vm0, %v1815_v5 }
  0x93   : > { %1586 = vmatprep.subr.msk.bf16.mxu0 %vm245_vm2, %v494_v38  ;;  %v491_v39 = vpop.permute.xlu1 %490  ;;  %1666 = vmatprep.subr.bf16.mxu1 %v1815_v5 }
  0x94   : > { %v495_v44 = vsel %vm492_vm4, %v489_v37, %v491_v39  ;;  %v1804_v39 = vld [vmem:[%s2024_s1 + $0x38] sm:$0xff]  }
  0x95   : > { %v626_v40 = vpop.permute.xlu0 %625  ;;  %v506_v48 = vsel %vm245_vm2, %v495_v44, 0 }
  0x97   : > { %v628_v43 = vpop.permute.xlu1 %627 }
  0x98   : > { %v634_v51 = vsel %vm633_vm5, %v626_v40, %v628_v43 }
  0x99   : > { %v630_v46 = vpop.permute.xlu0 %629  ;;  %v641_v56 = vsel %vm245_vm2, %v634_v51, 0 }
  0x9a   : > { %v635_v47 = vsel %vm633_vm5, %v628_v43, %v630_v46  ;;  %v1805_v43 = vld [vmem:[%s2024_s1 + $0x40] sm:$0xff]  }
  0x9b   : > { %1581 = vmatmul.mubr.msk.bf16.vlgmr.msra.gmra.mrb[0].mxu0 %vm241_vm3, %v1798_v42  ;;  %v632_v50 = vpop.permute.xlu1 %631 }
  0x9c   : > { %509 = vmatpush1.bf16.msra.mxu0 %v500_v45  ;;  %540 = vmatprep.mubr.bf16.mxu0 %v1816_v6  ;;  %v636_v55 = vsel %vm633_vm5, %v630_v46, %v632_v50 }
  0x9d   : > { %1663 = vmatmul.mubr.msk.bf16.vlgmr.msra.gmra.mrb[0].mxu1 %vm241_vm3, %v1798_v42  ;;  %1592 = vmatprep.subr.msk.bf16.mxu0 %vm245_vm2, %v635_v47  ;;  %v767_v49 = vpop.permute.xlu0 %766  ;;  %v647_v58 = vsel %vm245_vm2, %v636_v55, 0 }
  0x9e   : > { %1667 = vmatpush3.bf16.msra.mxu1 %v506_v48  ;;  %1668 = vmatprep.mubr.msk.bf16.mxu1 %vm1817_vm0, %v1815_v5 }
  0x9f   : > { %1672 = vmatprep.subr.bf16.mxu1 %v1815_v5  ;;  %v769_v53 = vpop.permute.xlu1 %768 }
  0xa0   : > { %v775_v61 = vsel %vm774_vm6, %v767_v49, %v769_v53 }
  0xa1   : > { %v771_v54 = vpop.permute.xlu0 %770  ;;  %v782_v2 = vsel %vm245_vm2, %v775_v61, 0 }
  0xa2   : > { %v776_v57 = vsel %vm774_vm6, %v769_v53, %v771_v54 }
  0xa3   : > { %v773_v60 = vpop.permute.xlu1 %772 }
  0xa4   : > { %v777_v1 = vsel %vm774_vm6, %v771_v54, %v773_v60 }
  0xa5   : > { %v908_v59 = vpop.permute.xlu0 %907  ;;  %v788_v4 = vsel %vm245_vm2, %v777_v1, 0 }
  0xa7   : > { %1587 = vmatmul.mubr.msk.bf16.vlgmr.msra.gmra.mrb[0].mxu0 %vm241_vm3, %v1799_v52  ;;  %v910_v63 = vpop.permute.xlu1 %909 }
  0xa8   : > { %650 = vmatpush1.bf16.msra.mxu0 %v641_v56  ;;  %681 = vmatprep.mubr.bf16.mxu0 %v1816_v6  ;;  %v916_v9 = vsel %vm915_vm7, %v908_v59, %v910_v63 }
  0xa9   : > { %1669 = vmatmul.mubr.msk.bf16.vlgmr.msra.gmra.mrb[0].mxu1 %vm241_vm3, %v1799_v52  ;;  %1598 = vmatprep.subr.msk.bf16.mxu0 %vm245_vm2, %v776_v57  ;;  %v912_v0 = vpop.permute.xlu0 %911  ;;  %v923_v14 = vsel %vm245_vm2, %v916_v9, 0 }
  0xaa   : > { %1673 = vmatpush3.bf16.msra.mxu1 %v647_v58  ;;  %1674 = vmatprep.mubr.msk.bf16.mxu1 %vm1817_vm0, %v1815_v5  ;;  %v917_v3 = vsel %vm915_vm7, %v910_v63, %v912_v0 }
  0xab   : > { %1678 = vmatprep.subr.bf16.mxu1 %v1815_v5  ;;  %v914_v8 = vpop.permute.xlu1 %913 }
  0xac   : > { %v918_v13 = vsel %vm915_vm7, %v912_v0, %v914_v8 }
  0xad   : > { %v1049_v7 = vpop.permute.xlu0 %1048  ;;  %v929_v16 = vsel %vm245_vm2, %v918_v13, 0 }
  0xaf   : > { %v1051_v11 = vpop.permute.xlu1 %1050 }
  0xb0   : > { %v1057_v19 = vsel %vm1056_vm8, %v1049_v7, %v1051_v11 }
  0xb1   : > { %v1053_v12 = vpop.permute.xlu0 %1052  ;;  %v1064_v24 = vsel %vm245_vm2, %v1057_v19, 0 }
  0xb2   : > { %v1058_v15 = vsel %vm1056_vm8, %v1051_v11, %v1053_v12 }
  0xb3   : > { %1593 = vmatmul.mubr.msk.bf16.vlgmr.msra.gmra.mrb[0].mxu0 %vm241_vm3, %v1800_v62  ;;  %v1055_v18 = vpop.permute.xlu1 %1054 }
  0xb4   : > { %791 = vmatpush1.bf16.msra.mxu0 %v782_v2  ;;  %822 = vmatprep.mubr.bf16.mxu0 %v1816_v6  ;;  %v1059_v23 = vsel %vm1056_vm8, %v1053_v12, %v1055_v18 }
  0xb5   : > { %1675 = vmatmul.mubr.msk.bf16.vlgmr.msra.gmra.mrb[0].mxu1 %vm241_vm3, %v1800_v62  ;;  %1604 = vmatprep.subr.msk.bf16.mxu0 %vm245_vm2, %v917_v3  ;;  %v1190_v17 = vpop.permute.xlu0 %1189  ;;  %v1070_v26 = vsel %vm245_vm2, %v1059_v23, 0 }
  0xb6   : > { %1679 = vmatpush3.bf16.msra.mxu1 %v788_v4  ;;  %1680 = vmatprep.mubr.msk.bf16.mxu1 %vm1817_vm0, %v1815_v5 }
  0xb7   : > { %1684 = vmatprep.subr.bf16.mxu1 %v1815_v5  ;;  %v1192_v21 = vpop.permute.xlu1 %1191 }
  0xb8   : > { %v1198_v29 = vsel %vm1197_vm9, %v1190_v17, %v1192_v21 }
  0xb9   : > { %v1194_v22 = vpop.permute.xlu0 %1193  ;;  %v1205_v34 = vsel %vm245_vm2, %v1198_v29, 0 }
  0xba   : > { %v1199_v25 = vsel %vm1197_vm9, %v1192_v21, %v1194_v22 }
  0xbb   : > { %v1196_v28 = vpop.permute.xlu1 %1195 }
  0xbc   : > { %v1200_v33 = vsel %vm1197_vm9, %v1194_v22, %v1196_v28 }
  0xbd   : > { %v1331_v27 = vpop.permute.xlu0 %1330  ;;  %v1211_v36 = vsel %vm245_vm2, %v1200_v33, 0 }
  0xbf   : > { %1599 = vmatmul.mubr.msk.bf16.vlgmr.msra.gmra.mrb[0].mxu0 %vm241_vm3, %v1801_v10  ;;  %v1333_v31 = vpop.permute.xlu1 %1332 }
  0xc0   : > { %932 = vmatpush1.bf16.msra.mxu0 %v923_v14  ;;  %963 = vmatprep.mubr.bf16.mxu0 %v1816_v6  ;;  %v1339_v38 = vsel %vm1338_vm10, %v1331_v27, %v1333_v31 }
  0xc1   : > { %1681 = vmatmul.mubr.msk.bf16.vlgmr.msra.gmra.mrb[0].mxu1 %vm241_vm3, %v1801_v10  ;;  %1610 = vmatprep.subr.msk.bf16.mxu0 %vm245_vm2, %v1058_v15  ;;  %v1335_v32 = vpop.permute.xlu0 %1334  ;;  %v1346_v41 = vsel %vm245_vm2, %v1339_v38, 0 }
  0xc2   : > { %1685 = vmatpush3.bf16.msra.mxu1 %v929_v16  ;;  %1686 = vmatprep.mubr.msk.bf16.mxu1 %vm1817_vm0, %v1815_v5  ;;  %v1340_v35 = vsel %vm1338_vm10, %v1333_v31, %v1335_v32 }
  0xc3   : > { %1690 = vmatprep.subr.bf16.mxu1 %v1815_v5  ;;  %v1337_v37 = vpop.permute.xlu1 %1336 }
  0xc4   : > { %v1341_v40 = vsel %vm1338_vm10, %v1335_v32, %v1337_v37 }
  0xc5   : > { %v1352_v42 = vsel %vm245_vm2, %v1341_v40, 0 }
  0xcb   : > { %1605 = vmatmul.mubr.msk.bf16.vlgmr.msra.gmra.mrb[0].mxu0 %vm241_vm3, %v1802_v20 }
  0xcc   : > { %1073 = vmatpush1.bf16.msra.mxu0 %v1064_v24  ;;  %1104 = vmatprep.mubr.bf16.mxu0 %v1816_v6 }
  0xcd   : > { %1687 = vmatmul.mubr.msk.bf16.vlgmr.msra.gmra.mrb[0].mxu1 %vm241_vm3, %v1802_v20  ;;  %1616 = vmatprep.subr.msk.bf16.mxu0 %vm245_vm2, %v1199_v25 }
  0xce   : > { %1691 = vmatpush3.bf16.msra.mxu1 %v1070_v26  ;;  %1692 = vmatprep.mubr.msk.bf16.mxu1 %vm1817_vm0, %v1815_v5 }
  0xcf   : > { %1696 = vmatprep.subr.bf16.mxu1 %v1815_v5 }
  0xd2   : > { %v1449_v45 = vpop.permute.xlu0 %1448 }
  0xd4   : > { %v1454_v44 = vpop.permute.xlu1 %1453 }
  0xd6   : > { %v1472_v57 = vpop.permute.xlu0 %1471 }
  0xd7   : > { %1611 = vmatmul.mubr.msk.bf16.vlgmr.msra.gmra.mrb[0].mxu0 %vm241_vm3, %v1803_v30 }
  0xd8   : > { %1214 = vmatpush1.bf16.msra.mxu0 %v1205_v34  ;;  %1245 = vmatprep.mubr.bf16.mxu0 %v1816_v6  ;;  %v1467_v47 = vpop.permute.xlu1 %1466 }
  0xd9   : > { %1693 = vmatmul.mubr.msk.bf16.vlgmr.msra.gmra.mrb[0].mxu1 %vm241_vm3, %v1803_v30  ;;  %1622 = vmatprep.subr.msk.bf16.mxu0 %vm245_vm2, %v1340_v35 }
  0xda   : > { %1697 = vmatpush3.bf16.msra.mxu1 %v1211_v36  ;;  %1698 = vmatprep.mubr.msk.bf16.mxu1 %vm1817_vm0, %v1815_v5 }
  0xdb   : > { %1702 = vmatprep.subr.bf16.mxu1 %v1815_v5 }
  0xe3   : > { %1617 = vmatmul.mubr.msk.bf16.vlgmr.msra.gmra.mrb[0].mxu0 %vm241_vm3, %v1804_v39 }
  0xe4   : > { %1355 = vmatpush1.bf16.msra.mxu0 %v1346_v41  ;;  %1386 = vmatprep.mubr.bf16.mxu0 %v1816_v6 }
  0xe5   : > { %1699 = vmatmul.mubr.msk.bf16.vlgmr.msra.gmra.mrb[0].mxu1 %vm241_vm3, %v1804_v39 }
  0xe6   : > { %1703 = vmatpush3.bf16.msra.mxu1 %v1352_v42  ;;  %1704 = vmatprep.mubr.msk.bf16.mxu1 %vm1817_vm0, %v1815_v5 }
  0xef   : > { %1623 = vmatmul.mubr.msk.bf16.vlgmr.msra.gmra.mrb[0].mxu0 %vm241_vm3, %v1805_v43 }
  0xf1   : > { %1705 = vmatmul.mubr.msk.bf16.vlgmr.msra.gmra.mrb[0].mxu1 %vm241_vm3, %v1805_v43 }
 0x1c2   : > { %v1388_v46 = vpop.f32.mrb[0].mxu0 }
 0x1c3   : > { %v1456_v6 = vmul.f32 %v1449_v45, %v1388_v46  ;;  %v1390_v48 = vpop.f32.mrb[1].mxu0 }
 0x1c4   : > { %v1457_v49 = vmul.f32 %v1449_v45, %v1390_v48  ;;  %v1392_v50 = vpop.f32.mrb[2].mxu0  ;;  %v1431_v51 = vpop.f32.mrb[0].mxu1 }
 0x1c5   : > { %v1474_v52 = vadd.f32 %v1467_v47, %v1456_v6  ;;  %v1459_v5 = vmul.f32 %v1454_v44, %v1392_v50  ;;  %v1458_v53 = vmul.f32 %v1449_v45, %v1431_v51  ;;  %v1394_v54 = vpop.f32.mrb[3].mxu0  ;;  %v1706_v55 = vpop.f32.mrb[1].mxu1 }
 0x1c6   : > { %v1475_v56 = vadd.f32 %v1467_v47, %v1457_v49  ;;  %v1460_v58 = vmul.f32 %v1454_v44, %v1394_v54  ;;  %v1434_v59 = vpop.f32.mrb[2].mxu1 }
 0x1c7   : > { %v1480_v60 = vmax.f32 %v1474_v52, 0.0  ;;  %v1476_v61 = vadd.f32 %v1467_v47, %v1458_v53  ;;  %v1477_v62 = vadd.f32 %v1472_v57, %v1459_v5  ;;  %v1461_v63 = vmul.f32 %v1454_v44, %v1434_v59  ;;  %v1707_v0 = vpop.f32.mrb[3].mxu1 }
 0x1c8   : > { %v1481_v1 = vmax.f32 %v1475_v56, 0.0  ;;  %v1478_v2 = vadd.f32 %v1472_v57, %v1460_v58 }
 0x1c9   : > { %v1482_v3 = vmax.f32 %v1476_v61, 0.0  ;;  %v1483_v4 = vmax.f32 %v1477_v62, 0.0  ;;  %v1479_v7 = vadd.f32 %v1472_v57, %v1461_v63 }
 0x1ca   : > { %v1632_v8 = vpack.c.bf16 %v1481_v1, %v1480_v60  ;;  %v1484_v9 = vmax.f32 %v1478_v2, 0.0 }
 0x1cb   : > { %v1633_v10 = vpack.c.bf16 %v1482_v3, %v1482_v3  ;;  %v1485_v11 = vmax.f32 %v1479_v7, 0.0 }
 0x1cc   : > { %1506 = vst [vmem:[%s197_s16] sm:$0xff] %v1632_v8  ;;  %v1634_v12 = vpack.c.bf16 %v1484_v9, %v1483_v4 }
 0x1cd   : > { %1507 = vst [vmem:[%s197_s16 + $0x8] sm:$0xf] %v1633_v10  ;;  %v1635_v13 = vpack.c.bf16 %v1485_v11, %v1485_v11 }
 0x1ce   : > { %1508 = vst [vmem:[%s197_s16 + $0xc] sm:$0xff] %v1634_v12 }
 0x1cf   : > { %1509 = vst [vmem:[%s197_s16 + $0x14] sm:$0xf] %v1635_v13 }
 0x1d0 PF: > { %s14_s15 = sadd.s32 1, %s1812_s15  }
 0x1d1   : > { %p11_p4 = scmp.ge.s32.totalorder %s14_s15, 4  }
 0x1d3   :  { %13 = sbr.rel (!%p11_p4) target bundleno = 1 (0x1), region = 74 }

</bundles_post_ra>
